<compile_context>
chip_gen: v6e
topology: v6e:2x2x1
jax: 0.10.0
libtpu: 0.0.40
codegen_flags: <defaults>
</compile_context>

<pallas_src>
import functools

import jax
import jax.numpy as jnp
from jax.experimental import pallas as pl
from jax.experimental.pallas import tpu as pltpu

TRIM_H = 28
TRIM_W = 28


def _round_up(x, m):
    return ((x + m - 1) // m) * m


def _sublane_pack(itemsize):
    # f32 -> 8, bf16 -> 16, int8/fp8 -> 32 sublane packing.
    return max(8, 32 // int(itemsize))


def _padded_plane_bytes(th, tw, itemsize):
    # Bytes one (th, tw) plane actually occupies in VMEM after (sublane, 128)
    # tile padding -- what the compiler allocates, not th*tw*itemsize.
    return _round_up(th, _sublane_pack(itemsize)) * _round_up(tw, 128) * int(itemsize)


def _largest_divisor_at_most(p, cap):
    cap = max(1, min(p, cap))
    best = 1
    d = 1
    while d * d <= p:
        if p % d == 0:
            if d <= cap:
                best = max(best, d)
            q = p // d
            if q <= cap:
                best = max(best, q)
        d += 1
    return best


def _vmem_budgets():
    # Generation-aware scratch budget / scoped-VMEM limit:
    #   v5e/v6e: 128 MiB physical -> 32 MiB scratch budget, 64 MiB limit.
    #   v7x:      64 MiB physical -> 16 MiB scratch budget, 32 MiB limit.
    try:
        cap = int(pltpu.get_tpu_info().vmem_capacity_bytes)
    except Exception:
        cap = 64 * 1024 * 1024  # conservative (v7x-sized) fallback
    scratch_budget = min(cap // 4, 48 * 1024 * 1024)
    vmem_limit = min(cap // 2, 64 * 1024 * 1024)
    return scratch_budget, vmem_limit


# ---------------------------------------------------------------------------
# Primary path: DMA-only streamer (no vector loads/stores in the body).
# ---------------------------------------------------------------------------
def _trim_dma_kernel(x_hbm, o_hbm, stage, in_sem, out_sem, *, tb, th, tw, p):
    outer = pl.program_id(0)
    inner = pl.program_id(1)
    n_inner = pl.num_programs(1)
    chunk = outer * n_inner + inner

    def start_of(c):
        # Ragged tail folds into the previous chunk's range (identical
        # duplicate writes); every chunk keeps the static size tb.
        return jnp.minimum(c * tb, p - tb)

    def in_copy(c, slot):
        return pltpu.make_async_copy(
            x_hbm.at[pl.ds(start_of(c), tb), pl.ds(0, th), pl.ds(0, tw)],
            stage.at[slot],
            in_sem.at[slot],
        )

    def out_copy(c, slot):
        return pltpu.make_async_copy(
            stage.at[slot],
            o_hbm.at[pl.ds(start_of(c), tb)],
            out_sem.at[slot],
        )

    slot = inner % 2
    nslot = 1 - slot

    # Prime the pipeline at the start of each (per-core) segment.
    @pl.when(inner == 0)
    def _():
        in_copy(chunk, slot).start()

    # Prefetch the next chunk into the other slot; first drain the output DMA
    # that last used that slot (issued on the previous step).
    @pl.when(inner + 1 < n_inner)
    def _():
        @pl.when(inner >= 1)
        def _():
            out_copy(chunk - 1, nslot).wait()

        in_copy(chunk + 1, nslot).start()

    # Current chunk: wait for its input window, then stream it straight out.
    in_copy(chunk, slot).wait()
    out_copy(chunk, slot).start()

    # Drain all outstanding output DMAs at the end of the segment.
    @pl.when(inner == n_inner - 1)
    def _():
        @pl.when(inner >= 1)
        def _():
            out_copy(chunk - 1, nslot).wait()

        out_copy(chunk, slot).wait()


def _trim_dma(x_flat, th, tw):
    p, _, _ = x_flat.shape
    itemsize = jnp.dtype(x_flat.dtype).itemsize
    scratch_budget, vmem_limit = _vmem_budgets()

    plane_bytes = _padded_plane_bytes(th, tw, itemsize)
    tb_budget = max(1, scratch_budget // (2 * plane_bytes))
    # Keep >= ~4 chunks where P allows so the v7x megacore split and the
    # double-buffer overlap are actually exercised.
    tb_cap = max(1, min(p, tb_budget, pl.cdiv(p, 4)))

    tb = _largest_divisor_at_most(p, tb_cap)
    clamp_tail = tb < max(1, tb_cap // 2)
    if clamp_tail:
        tb = tb_cap
    n_chunks = pl.cdiv(p, tb)

    # Outer "parallel" axis (megacore), inner "arbitrary" carries DMA state.
    n_outer = 2 if (not clamp_tail and n_chunks % 2 == 0) else 1
    n_inner = n_chunks // n_outer

    kernel = functools.partial(_trim_dma_kernel, tb=tb, th=th, tw=tw, p=p)
    cost = pl.CostEstimate(
        flops=0,
        transcendentals=0,
        bytes_accessed=2 * p * th * tw * itemsize,  # exact read + write
    )

    return pl.pallas_call(
        kernel,
        out_shape=jax.ShapeDtypeStruct((p, th, tw), x_flat.dtype),
        grid=(n_outer, n_inner),
        in_specs=[pl.BlockSpec(memory_space=pl.ANY)],
        out_specs=pl.BlockSpec(memory_space=pl.ANY),
        scratch_shapes=[
            pltpu.VMEM((2, tb, th, tw), x_flat.dtype),
            pltpu.SemaphoreType.DMA((2,)),
            pltpu.SemaphoreType.DMA((2,)),
        ],
        compiler_params=pltpu.CompilerParams(
            dimension_semantics=("parallel", "arbitrary"),
            vmem_limit_bytes=vmem_limit,
        ),
        cost_estimate=cost,
    )(x_flat)


# ---------------------------------------------------------------------------
# Fallback path: BlockSpec auto-pipelined copy with padded-footprint math.
# ---------------------------------------------------------------------------
def _trim_copy_kernel(x_ref, o_ref):
    o_ref[...] = x_ref[:, : o_ref.shape[1], : o_ref.shape[2]]


def _trim_blockspec(x_flat, th, tw):
    p, h, w = x_flat.shape
    itemsize = jnp.dtype(x_flat.dtype).itemsize
    scratch_budget, vmem_limit = _vmem_budgets()

    h_blk = h if h <= 32 else 32      # covers rows [0, 28); 32 % 8 == 0
    w_blk = w if w <= 128 else 128    # covers cols [0, 28)
    per_plane = 2 * (_padded_plane_bytes(h_blk, w_blk, itemsize)
                     + _padded_plane_bytes(th, tw, itemsize))  # double-buffered
    tb = max(1, min(p, scratch_budget // per_plane, max(1, pl.cdiv(p, 4))))

    return pl.pallas_call(
        _trim_copy_kernel,
        out_shape=jax.ShapeDtypeStruct((p, th, tw), x_flat.dtype),
        grid=(pl.cdiv(p, tb),),
        in_specs=[pl.BlockSpec((tb, h_blk, w_blk), lambda i: (i, 0, 0))],
        out_specs=pl.BlockSpec((tb, th, tw), lambda i: (i, 0, 0)),
        compiler_params=pltpu.CompilerParams(
            dimension_semantics=("parallel",),
            vmem_limit_bytes=vmem_limit,
        ),
    )(x_flat)


def trim(x):
    """x: (N, C, H, W). Returns x[:, :, :28, :28] (PyTorch Trim semantics)."""
    n, c, h, w = x.shape
    th = min(TRIM_H, h)
    tw = min(TRIM_W, w)
    p = n * c

    x_flat = x.reshape(p, h, w)  # free (contiguous) collapse of (N, C)
    try:
        out_flat = _trim_dma(x_flat, th, tw)
    except Exception:
        # Safety net: auto-pipelined BlockSpec copy (still a Pallas kernel).
        out_flat = _trim_blockspec(x_flat, th, tw)
    return out_flat.reshape(n, c, th, tw)


if __name__ == "__main__":
    key = jax.random.PRNGKey(0)
    k1, k2 = jax.random.split(key)

    # Spatial >= 28 so the trim is meaningful (the module slices [:28, :28]).
    x = jax.random.normal(k1, (2, 4, 32, 32), dtype=jnp.float32)
    out = jax.block_until_ready(trim(x))
    assert out.shape == (2, 4, 28, 28), out.shape
    assert out.dtype == x.dtype
    assert jnp.array_equal(out, x[:, :, :28, :28]), "mismatch vs reference slice"

    # Awkward plane count (P = 13, prime) exercises the ragged-tail handling.
    x2 = jax.random.normal(k2, (1, 13, 32, 32), dtype=jnp.float32)
    out2 = jax.block_until_ready(trim(x2))
    assert out2.shape == (1, 13, 28, 28), out2.shape
    assert jnp.array_equal(out2, x2[:, :, :28, :28]), "mismatch on ragged-tail case"

    print("KERNEL_OK")
</pallas_src>

<mosaic_0001>
module attributes {stable_mosaic.version = 11 : i64} {
  func.func @_trim_dma_kernel(%arg0: i32, %arg1: i32, %arg2: memref<8x32x32xf32, #tpu.memory_space<any>>, %arg3: memref<8x28x28xf32, #tpu.memory_space<any>>, %arg4: memref<2x2x28x28xf32, #tpu.memory_space<vmem>>, %arg5: memref<2x!tpu.dma_semaphore, #tpu.memory_space<semaphore_mem>>, %arg6: memref<2x!tpu.dma_semaphore, #tpu.memory_space<semaphore_mem>>) attributes {dimension_semantics = [#tpu.dimension_semantics<parallel>, #tpu.dimension_semantics<arbitrary>], iteration_bounds = array<i64: 2, 2>, scalar_prefetch = 0 : i64, scratch_operands = 3 : i64, tpu.core_type = #tpu.core_type<tc>, window_params = [{}, {}]} {
    %c2_i32 = arith.constant 2 : i32
    %0 = arith.muli %arg0, %c2_i32 : i32
    %1 = arith.addi %0, %arg1 : i32
    %c2_i32_0 = arith.constant 2 : i32
    %c0_i32 = arith.constant 0 : i32
    %2 = arith.cmpi eq, %c2_i32_0, %c0_i32 : i32
    %c1_i32 = arith.constant 1 : i32
    %3 = arith.select %2, %c1_i32, %c2_i32_0 : i32
    %4 = arith.remsi %arg1, %3 : i32
    %c0_i32_1 = arith.constant 0 : i32
    %5 = arith.cmpi ne, %4, %c0_i32_1 : i32
    %c0_i32_2 = arith.constant 0 : i32
    %6 = arith.cmpi slt, %4, %c0_i32_2 : i32
    %c0_i32_3 = arith.constant 0 : i32
    %7 = arith.cmpi slt, %3, %c0_i32_3 : i32
    %8 = arith.xori %6, %7 : i1
    %9 = arith.andi %8, %5 : i1
    %10 = arith.addi %4, %3 : i32
    %11 = arith.select %9, %10, %4 : i32
    %c1_i32_4 = arith.constant 1 : i32
    %12 = arith.subi %c1_i32_4, %11 : i32
    %c0_i32_5 = arith.constant 0 : i32
    %13 = arith.cmpi eq, %arg1, %c0_i32_5 : i32
    %14 = arith.extui %13 : i1 to i32
    %c0_i32_6 = arith.constant 0 : i32
    %15 = arith.cmpi ne, %14, %c0_i32_6 : i32
    scf.if %15 {
      %c2_i32_25 = arith.constant 2 : i32
      %37 = arith.muli %1, %c2_i32_25 : i32
      %c6_i32_26 = arith.constant 6 : i32
      %38 = arith.minsi %37, %c6_i32_26 : i32
      %c0_i32_27 = arith.constant 0 : i32
      %c0_i32_28 = arith.constant 0 : i32
      %39 = tpu.memref_slice %arg2[%38, %c0_i32_27, %c0_i32_28] : memref<8x32x32xf32, #tpu.memory_space<any>> -> memref<2x28x28xf32, #tpu.memory_space<any>>
      %c0_i32_29 = arith.constant 0 : i32
      %c0_i32_30 = arith.constant 0 : i32
      %c0_i32_31 = arith.constant 0 : i32
      %40 = tpu.memref_slice %arg4[%11, %c0_i32_29, %c0_i32_30, %c0_i32_31] : memref<2x2x28x28xf32, #tpu.memory_space<vmem>> -> memref<1x2x28x28xf32, #tpu.memory_space<vmem>>
      %41 = tpu.memref_squeeze %40 : memref<1x2x28x28xf32, #tpu.memory_space<vmem>> -> memref<2x28x28xf32, #tpu.memory_space<vmem>>
      %42 = tpu.memref_slice %arg5[%11] : memref<2x!tpu.dma_semaphore, #tpu.memory_space<semaphore_mem>> -> memref<1x!tpu.dma_semaphore, #tpu.memory_space<semaphore_mem>>
      %43 = tpu.memref_squeeze %42 : memref<1x!tpu.dma_semaphore, #tpu.memory_space<semaphore_mem>> -> memref<!tpu.dma_semaphore, #tpu.memory_space<semaphore_mem>>
      tpu.enqueue_dma source(%39 : memref<2x28x28xf32, #tpu.memory_space<any>>) target(%41 : memref<2x28x28xf32, #tpu.memory_space<vmem>>) target_semaphore(%43 : memref<!tpu.dma_semaphore, #tpu.memory_space<semaphore_mem>>)
    } else {
    }
    %c1_i32_7 = arith.constant 1 : i32
    %16 = arith.addi %arg1, %c1_i32_7 : i32
    %c2_i32_8 = arith.constant 2 : i32
    %17 = arith.cmpi slt, %16, %c2_i32_8 : i32
    %18 = arith.extui %17 : i1 to i32
    %c0_i32_9 = arith.constant 0 : i32
    %19 = arith.cmpi ne, %18, %c0_i32_9 : i32
    scf.if %19 {
      %c1_i32_25 = arith.constant 1 : i32
      %37 = arith.cmpi sge, %arg1, %c1_i32_25 : i32
      %38 = arith.extui %37 : i1 to i32
      %c0_i32_26 = arith.constant 0 : i32
      %39 = arith.cmpi ne, %38, %c0_i32_26 : i32
      scf.if %39 {
        %c1_i32_35 = arith.constant 1 : i32
        %48 = arith.subi %1, %c1_i32_35 : i32
        %c2_i32_36 = arith.constant 2 : i32
        %49 = arith.muli %48, %c2_i32_36 : i32
        %c6_i32_37 = arith.constant 6 : i32
        %50 = arith.minsi %49, %c6_i32_37 : i32
        %c0_i32_38 = arith.constant 0 : i32
        %c0_i32_39 = arith.constant 0 : i32
        %c0_i32_40 = arith.constant 0 : i32
        %51 = tpu.memref_slice %arg4[%12, %c0_i32_38, %c0_i32_39, %c0_i32_40] : memref<2x2x28x28xf32, #tpu.memory_space<vmem>> -> memref<1x2x28x28xf32, #tpu.memory_space<vmem>>
        %52 = tpu.memref_squeeze %51 : memref<1x2x28x28xf32, #tpu.memory_space<vmem>> -> memref<2x28x28xf32, #tpu.memory_space<vmem>>
        %c0_i32_41 = arith.constant 0 : i32
        %c0_i32_42 = arith.constant 0 : i32
        %53 = tpu.memref_slice %arg3[%50, %c0_i32_41, %c0_i32_42] : memref<8x28x28xf32, #tpu.memory_space<any>> -> memref<2x28x28xf32, #tpu.memory_space<any>>
        %54 = tpu.memref_slice %arg6[%12] : memref<2x!tpu.dma_semaphore, #tpu.memory_space<semaphore_mem>> -> memref<1x!tpu.dma_semaphore, #tpu.memory_space<semaphore_mem>>
        %55 = tpu.memref_squeeze %54 : memref<1x!tpu.dma_semaphore, #tpu.memory_space<semaphore_mem>> -> memref<!tpu.dma_semaphore, #tpu.memory_space<semaphore_mem>>
        tpu.wait_dma2 semaphore(%55 : memref<!tpu.dma_semaphore, #tpu.memory_space<semaphore_mem>>) src(%52 : memref<2x28x28xf32, #tpu.memory_space<vmem>>) dst(%53 : memref<2x28x28xf32, #tpu.memory_space<any>>)
      } else {
      }
      %c1_i32_27 = arith.constant 1 : i32
      %40 = arith.addi %1, %c1_i32_27 : i32
      %c2_i32_28 = arith.constant 2 : i32
      %41 = arith.muli %40, %c2_i32_28 : i32
      %c6_i32_29 = arith.constant 6 : i32
      %42 = arith.minsi %41, %c6_i32_29 : i32
      %c0_i32_30 = arith.constant 0 : i32
      %c0_i32_31 = arith.constant 0 : i32
      %43 = tpu.memref_slice %arg2[%42, %c0_i32_30, %c0_i32_31] : memref<8x32x32xf32, #tpu.memory_space<any>> -> memref<2x28x28xf32, #tpu.memory_space<any>>
      %c0_i32_32 = arith.constant 0 : i32
      %c0_i32_33 = arith.constant 0 : i32
      %c0_i32_34 = arith.constant 0 : i32
      %44 = tpu.memref_slice %arg4[%12, %c0_i32_32, %c0_i32_33, %c0_i32_34] : memref<2x2x28x28xf32, #tpu.memory_space<vmem>> -> memref<1x2x28x28xf32, #tpu.memory_space<vmem>>
      %45 = tpu.memref_squeeze %44 : memref<1x2x28x28xf32, #tpu.memory_space<vmem>> -> memref<2x28x28xf32, #tpu.memory_space<vmem>>
      %46 = tpu.memref_slice %arg5[%12] : memref<2x!tpu.dma_semaphore, #tpu.memory_space<semaphore_mem>> -> memref<1x!tpu.dma_semaphore, #tpu.memory_space<semaphore_mem>>
      %47 = tpu.memref_squeeze %46 : memref<1x!tpu.dma_semaphore, #tpu.memory_space<semaphore_mem>> -> memref<!tpu.dma_semaphore, #tpu.memory_space<semaphore_mem>>
      tpu.enqueue_dma source(%43 : memref<2x28x28xf32, #tpu.memory_space<any>>) target(%45 : memref<2x28x28xf32, #tpu.memory_space<vmem>>) target_semaphore(%47 : memref<!tpu.dma_semaphore, #tpu.memory_space<semaphore_mem>>)
    } else {
    }
    %c2_i32_10 = arith.constant 2 : i32
    %20 = arith.muli %1, %c2_i32_10 : i32
    %c6_i32 = arith.constant 6 : i32
    %21 = arith.minsi %20, %c6_i32 : i32
    %c0_i32_11 = arith.constant 0 : i32
    %c0_i32_12 = arith.constant 0 : i32
    %22 = tpu.memref_slice %arg2[%21, %c0_i32_11, %c0_i32_12] : memref<8x32x32xf32, #tpu.memory_space<any>> -> memref<2x28x28xf32, #tpu.memory_space<any>>
    %c0_i32_13 = arith.constant 0 : i32
    %c0_i32_14 = arith.constant 0 : i32
    %c0_i32_15 = arith.constant 0 : i32
    %23 = tpu.memref_slice %arg4[%11, %c0_i32_13, %c0_i32_14, %c0_i32_15] : memref<2x2x28x28xf32, #tpu.memory_space<vmem>> -> memref<1x2x28x28xf32, #tpu.memory_space<vmem>>
    %24 = tpu.memref_squeeze %23 : memref<1x2x28x28xf32, #tpu.memory_space<vmem>> -> memref<2x28x28xf32, #tpu.memory_space<vmem>>
    %25 = tpu.memref_slice %arg5[%11] : memref<2x!tpu.dma_semaphore, #tpu.memory_space<semaphore_mem>> -> memref<1x!tpu.dma_semaphore, #tpu.memory_space<semaphore_mem>>
    %26 = tpu.memref_squeeze %25 : memref<1x!tpu.dma_semaphore, #tpu.memory_space<semaphore_mem>> -> memref<!tpu.dma_semaphore, #tpu.memory_space<semaphore_mem>>
    tpu.wait_dma2 semaphore(%26 : memref<!tpu.dma_semaphore, #tpu.memory_space<semaphore_mem>>) src(%22 : memref<2x28x28xf32, #tpu.memory_space<any>>) dst(%24 : memref<2x28x28xf32, #tpu.memory_space<vmem>>)
    %c2_i32_16 = arith.constant 2 : i32
    %27 = arith.muli %1, %c2_i32_16 : i32
    %c6_i32_17 = arith.constant 6 : i32
    %28 = arith.minsi %27, %c6_i32_17 : i32
    %c0_i32_18 = arith.constant 0 : i32
    %c0_i32_19 = arith.constant 0 : i32
    %c0_i32_20 = arith.constant 0 : i32
    %29 = tpu.memref_slice %arg4[%11, %c0_i32_18, %c0_i32_19, %c0_i32_20] : memref<2x2x28x28xf32, #tpu.memory_space<vmem>> -> memref<1x2x28x28xf32, #tpu.memory_space<vmem>>
    %30 = tpu.memref_squeeze %29 : memref<1x2x28x28xf32, #tpu.memory_space<vmem>> -> memref<2x28x28xf32, #tpu.memory_space<vmem>>
    %c0_i32_21 = arith.constant 0 : i32
    %c0_i32_22 = arith.constant 0 : i32
    %31 = tpu.memref_slice %arg3[%28, %c0_i32_21, %c0_i32_22] : memref<8x28x28xf32, #tpu.memory_space<any>> -> memref<2x28x28xf32, #tpu.memory_space<any>>
    %32 = tpu.memref_slice %arg6[%11] : memref<2x!tpu.dma_semaphore, #tpu.memory_space<semaphore_mem>> -> memref<1x!tpu.dma_semaphore, #tpu.memory_space<semaphore_mem>>
    %33 = tpu.memref_squeeze %32 : memref<1x!tpu.dma_semaphore, #tpu.memory_space<semaphore_mem>> -> memref<!tpu.dma_semaphore, #tpu.memory_space<semaphore_mem>>
    tpu.enqueue_dma source(%30 : memref<2x28x28xf32, #tpu.memory_space<vmem>>) target(%31 : memref<2x28x28xf32, #tpu.memory_space<any>>) target_semaphore(%33 : memref<!tpu.dma_semaphore, #tpu.memory_space<semaphore_mem>>)
    %c1_i32_23 = arith.constant 1 : i32
    %34 = arith.cmpi eq, %arg1, %c1_i32_23 : i32
    %35 = arith.extui %34 : i1 to i32
    %c0_i32_24 = arith.constant 0 : i32
    %36 = arith.cmpi ne, %35, %c0_i32_24 : i32
    scf.if %36 {
      %c1_i32_25 = arith.constant 1 : i32
      %37 = arith.cmpi sge, %arg1, %c1_i32_25 : i32
      %38 = arith.extui %37 : i1 to i32
      %c0_i32_26 = arith.constant 0 : i32
      %39 = arith.cmpi ne, %38, %c0_i32_26 : i32
      scf.if %39 {
        %c1_i32_34 = arith.constant 1 : i32
        %47 = arith.subi %1, %c1_i32_34 : i32
        %c2_i32_35 = arith.constant 2 : i32
        %48 = arith.muli %47, %c2_i32_35 : i32
        %c6_i32_36 = arith.constant 6 : i32
        %49 = arith.minsi %48, %c6_i32_36 : i32
        %c0_i32_37 = arith.constant 0 : i32
        %c0_i32_38 = arith.constant 0 : i32
        %c0_i32_39 = arith.constant 0 : i32
        %50 = tpu.memref_slice %arg4[%12, %c0_i32_37, %c0_i32_38, %c0_i32_39] : memref<2x2x28x28xf32, #tpu.memory_space<vmem>> -> memref<1x2x28x28xf32, #tpu.memory_space<vmem>>
        %51 = tpu.memref_squeeze %50 : memref<1x2x28x28xf32, #tpu.memory_space<vmem>> -> memref<2x28x28xf32, #tpu.memory_space<vmem>>
        %c0_i32_40 = arith.constant 0 : i32
        %c0_i32_41 = arith.constant 0 : i32
        %52 = tpu.memref_slice %arg3[%49, %c0_i32_40, %c0_i32_41] : memref<8x28x28xf32, #tpu.memory_space<any>> -> memref<2x28x28xf32, #tpu.memory_space<any>>
        %53 = tpu.memref_slice %arg6[%12] : memref<2x!tpu.dma_semaphore, #tpu.memory_space<semaphore_mem>> -> memref<1x!tpu.dma_semaphore, #tpu.memory_space<semaphore_mem>>
        %54 = tpu.memref_squeeze %53 : memref<1x!tpu.dma_semaphore, #tpu.memory_space<semaphore_mem>> -> memref<!tpu.dma_semaphore, #tpu.memory_space<semaphore_mem>>
        tpu.wait_dma2 semaphore(%54 : memref<!tpu.dma_semaphore, #tpu.memory_space<semaphore_mem>>) src(%51 : memref<2x28x28xf32, #tpu.memory_space<vmem>>) dst(%52 : memref<2x28x28xf32, #tpu.memory_space<any>>)
      } else {
      }
      %c2_i32_27 = arith.constant 2 : i32
      %40 = arith.muli %1, %c2_i32_27 : i32
      %c6_i32_28 = arith.constant 6 : i32
      %41 = arith.minsi %40, %c6_i32_28 : i32
      %c0_i32_29 = arith.constant 0 : i32
      %c0_i32_30 = arith.constant 0 : i32
      %c0_i32_31 = arith.constant 0 : i32
      %42 = tpu.memref_slice %arg4[%11, %c0_i32_29, %c0_i32_30, %c0_i32_31] : memref<2x2x28x28xf32, #tpu.memory_space<vmem>> -> memref<1x2x28x28xf32, #tpu.memory_space<vmem>>
      %43 = tpu.memref_squeeze %42 : memref<1x2x28x28xf32, #tpu.memory_space<vmem>> -> memref<2x28x28xf32, #tpu.memory_space<vmem>>
      %c0_i32_32 = arith.constant 0 : i32
      %c0_i32_33 = arith.constant 0 : i32
      %44 = tpu.memref_slice %arg3[%41, %c0_i32_32, %c0_i32_33] : memref<8x28x28xf32, #tpu.memory_space<any>> -> memref<2x28x28xf32, #tpu.memory_space<any>>
      %45 = tpu.memref_slice %arg6[%11] : memref<2x!tpu.dma_semaphore, #tpu.memory_space<semaphore_mem>> -> memref<1x!tpu.dma_semaphore, #tpu.memory_space<semaphore_mem>>
      %46 = tpu.memref_squeeze %45 : memref<1x!tpu.dma_semaphore, #tpu.memory_space<semaphore_mem>> -> memref<!tpu.dma_semaphore, #tpu.memory_space<semaphore_mem>>
      tpu.wait_dma2 semaphore(%46 : memref<!tpu.dma_semaphore, #tpu.memory_space<semaphore_mem>>) src(%43 : memref<2x28x28xf32, #tpu.memory_space<vmem>>) dst(%44 : memref<2x28x28xf32, #tpu.memory_space<any>>)
    } else {
    }
    return
  }
}

module attributes {stable_mosaic.version = 11 : i64} {
  func.func @_trim_copy_kernel(%arg0: i32, %arg1: memref<2x32x32xf32, #tpu.memory_space<vmem>>, %arg2: memref<2x28x28xf32, #tpu.memory_space<vmem>>) attributes {dimension_semantics = [#tpu.dimension_semantics<parallel>], iteration_bounds = array<i64: 4>, scalar_prefetch = 0 : i64, scratch_operands = 0 : i64, tpu.core_type = #tpu.core_type<tc>, window_params = [{transform_indices = @transform_0, window_bounds = array<i64: 2, 32, 32>}, {transform_indices = @transform_1, window_bounds = array<i64: 2, 28, 28>}]} {
    %c0 = arith.constant 0 : index
    %c0_0 = arith.constant 0 : index
    %c0_1 = arith.constant 0 : index
    %0 = vector.load %arg1[%c0, %c0_0, %c0_1] : memref<2x32x32xf32, #tpu.memory_space<vmem>>, vector<2x28x28xf32>
    %c0_2 = arith.constant 0 : index
    %c0_3 = arith.constant 0 : index
    %c0_4 = arith.constant 0 : index
    %1 = vector.load %arg2[%c0_2, %c0_3, %c0_4] : memref<2x28x28xf32, #tpu.memory_space<vmem>>, vector<2x28x28xf32>
    tpu.vector_store %arg2[%c0_2, %c0_3, %c0_4], %0 {strides = array<i32>} : memref<2x28x28xf32, #tpu.memory_space<vmem>>, vector<2x28x28xf32>,
    return
  }
  func.func @transform_0(%arg0: i32) -> (i32, i32, i32) {
    %c0_i32 = arith.constant 0 : i32
    %c0_i32_0 = arith.constant 0 : i32
    %c0_i32_1 = arith.constant 0 : i32
    return %arg0, %c0_i32, %c0_i32_0 : i32, i32, i32
  }
  func.func @transform_1(%arg0: i32) -> (i32, i32, i32) {
    %c0_i32 = arith.constant 0 : i32
    %c0_i32_0 = arith.constant 0 : i32
    %c0_i32_1 = arith.constant 0 : i32
    return %arg0, %c0_i32, %c0_i32_0 : i32, i32, i32
  }
}

</mosaic_0001>

<bundles_post_ra>
// kernel: tpu_custom_call.1
= control target key start
LH: loop header
LB: loop body
LE: loop exit
PB: predicated region body
PF: predicated region fallthrough
CT: control target
= control target key end

     0   :  { %6 = vsyncpa [#allocation3], 0  ;;  %s473_s0 = inlined_call_operand.hbm [shape: f32[8,32,32], index: 0, kind: input, shape index: {}]   ;;  %s474_s1 = inlined_call_operand.vmem [shape: f32[8,28,28], index: 1, kind: output, shape index: {}]  }
   0x1   :  { %8 = vsyncpa [#allocation3 + $0x1], 0  ;;  %s365_s6 = smov 0   ;;  %s367_s7 = smov 0  }
   0x2   :  { %s369_s8 = smov 0   ;;  %s371_s9 = smov 0  }
   0x3 LB: > { %s229_s10 = sadd.s32 4294967295, %s350_s9   ;;  %s385_s11 = sadd.s32 1, %s350_s9   ;;  %s350_s9 = sphi %s371_s9, %s483_s9   ;;  %s346_s8 = sphi %s369_s8, %s482_s8   ;;  %s342_s7 = sphi %s367_s7, %s481_s7   ;;  %s338_s6 = sphi %s365_s6, %s480_s6  }
   0x4   : > { %s18_s12 = ssub.s32 %s350_s9, %s385_s11  ;;  %s21_s13 = sadd.s32 1, %s346_s8 }
   0x5   : > { %p19_p0 = scmp.eq.s32.totalorder %s18_s12, 0  ;;  %p28_p1 = scmp.ne.s32.totalorder %s346_s8, %s342_s7 }
   0x6   : > { %p29_p2 = scmp.eq.s32.totalorder %s350_s9, 0  ;;  %p34_p3 = scmp.ne.s32.totalorder %s342_s7, %s338_s6 }
   0x7   : > { %s395_s14 = scalar_select %p19_p0, %s346_s8, %s21_s13  }
   0x8   : > { %p30_p4 = por %p29_p2, %p28_p1  ;;  %p35_p5 = scmp.eq.s32.totalorder %s229_s10, 0 }
   0x9   : > { %p253_p6 = scmp.lt.s32.totalorder %s350_s9, 4  ;;  %s84_s16 = sand.u32 1, %s346_s8  }
   0xa   : > { %p400_p7 = por %p35_p5, %p34_p3  ;;  %s233_s17 = sshll.u32 %s84_s16, 6 }
   0xb   : > { %s245_s18 = sshll.u32 %s350_s9, 10  ;;  %s88_s22 = scalar_lea.vmem [#allocation2], %s233_s17 }
   0xc   : > { %s476_s15 = scalar_select %p400_p7, 1, 0 }
   0xd   : > { %s409_s21 = scalar_lea.hbm %s473_s0, %s245_s18  ;;  %s96_s23 = sshll.u32 %s88_s22, 4  ;;  %s411_s23 = int_to_ptr.vmem [resolvable:$true] %s96_s23 }
   0xe   : > { %p413_p8 = pnand %p253_p6, %p30_p4  ;;  %s418_s25 = scalar_lea.sflag [#allocation3], %s84_s16 }
   0xf   : > { %s288_s26 = scalar_lea.hbm %s409_s21, 1024  ;;  %s293_s29 = scalar_lea.hbm %s473_s0, 4096 }
  0x10   : > { %p289_p10 = scmp.ne.s32.totalorder %s409_s21, %s288_s26  ;;  %p290_p11 = pneg %p413_p8 }
  0x11   : > { %p294_p0 = scmp.lt.s32.totalorder %s409_s21, %s473_s0  ;;  %p295_p1 = scmp.lt.s32.totalorder %s293_s29, %s288_s26 }
  0x12   : > { %p291_p12 = pnand %p290_p11, %p289_p10 }
  0x13   : > { %p296_p2 = por %p295_p1, %p294_p0 }
  0x14   : > { %p292_p13 = pneg %p291_p12 }
  0x16   : > { %p297_p3 = pnand %p296_p2, %p292_p13 }
  0x18   : > { %300 = shalt.err (!%p297_p3)
}
  0x19   : > { %s301_s3 = scalar_lea.vmem %s411_s23, 1024  ;;  %s352_s4 = smov [#allocation2]  }
  0x1a   : > { %p302_p4 = scmp.ne.s32.totalorder %s411_s23, %s301_s3  ;;  %s306_s5 = sshll.u32 %s352_s4, 4  ;;  %s307_s5 = int_to_ptr.vmem [resolvable:$false] %s306_s5 }
  0x1b   : > { %s308_s6 = scalar_lea.vmem %s307_s5, 2048  ;;  %p309_p10 = scmp.lt.s32.totalorder %s411_s23, %s307_s5 }
  0x1c   : > { %p304_p5 = pnand %p302_p4, %p290_p11  ;;  %p310_p12 = scmp.lt.s32.totalorder %s308_s6, %s301_s3 }
  0x1e   : > { %p305_p6 = pneg %p304_p5  ;;  %p311_p9 = por %p310_p12, %p309_p10 }
  0x20   : > { %p312_p7 = pnand %p311_p9, %p305_p6 }
  0x22   : > { %315 = shalt.err (!%p312_p7)
}
  0x23   : > { %s353_s12 = smov 128   ;;  %s354_s13 = smov 8  }
  0x24   : > { %252 = dma.hbm_to_vmem [thread:$0]  (!%p413_p8), %s409_s21, 1024, %s411_s23, %s418_s25, %s353_s12, %s353_s12, %s354_s13  }
  0x25   : > { %p104_p11 = scmp.lt.s32.totalorder %s350_s9, 5  ;;  %p478_p13 = scmp.ge.s32.totalorder %s350_s9, 1 }
  0x27   : > { %p105_p0 = pnand %p478_p13, %p104_p11 }
  0x28   : > { %s110_s16 = sand.u32 (!%p105_p0), 1, %s342_s7   ;;  %p479_p7 = scmp.ne.s32.totalorder (!%p105_p0), %s476_s15, 0 }
  0x29   : > { %108 = sbr.rel (%p105_p0) target bundleno = 57 (0x39), region = 24  ;;  %s238_s17 = sshll.u32 (!%p105_p0), %s110_s16, 6 }
  0x2a   : > { %s111_s18 = scalar_lea.sflag (!%p105_p0), [#allocation3], %s110_s16  ;;  %s114_s19 = scalar_lea.vmem (!%p105_p0), [#allocation2], %s238_s17 }
  0x2e   : > { %333 = dma.done.wait (%p479_p7), %s111_s18, 1024  }
  0x2f   : > { %335 = vsyncadd (%p479_p7), %s111_s18, 4294966272  ;;  %s239_s20 = sshll.u32 %s229_s10, 1  ;;  %vm150_vm0 = vcmask 228352   ;;  %vm154_vm1 = vcmask 224256   ;;  %v142_v0 = vld [vmem:[%s114_s19] sm:$0xff]  ;;  %v143_v1 = vld [vmem:[%s114_s19 + $0x8] sm:$0xff] }
  0x30   : > { %p136_p9 = scmp.lt.s32.totalorder %s239_s20, 7  ;;  %v144_v2 = vld [vmem:[%s114_s19 + $0x10] sm:$0xff]  ;;  %v145_v3 = vld [vmem:[%s114_s19 + $0x18] sm:$0xf]  ;;  %v146_v4 = vld [vmem:[%s114_s19 + $0x20] sm:$0xff] }
  0x31   : > { %v147_v5 = vld [vmem:[%s114_s19 + $0x28] sm:$0xff]  ;;  %v148_v6 = vld [vmem:[%s114_s19 + $0x30] sm:$0xff]  ;;  %v149_v7 = vld [vmem:[%s114_s19 + $0x38] sm:$0xf] }
  0x32   : > { %s485_s20 = smov (!%p136_p9, %s239_s20), 7 }
  0x33   : > { %s246_s21 = sshll.u32 %s485_s20, 5 }
  0x34   : > { %s140_s24 = scalar_lea.vmem %s474_s1, %s246_s21 }
  0x35   : > { %151 = vst.msk [vmem:[%s140_s24] sm:$0xff] %vm150_vm0, %v142_v0  ;;  %152 = vst.msk [vmem:[%s140_s24 + $0x8] sm:$0xff] %vm150_vm0, %v143_v1 }
  0x36   : > { %153 = vst.msk [vmem:[%s140_s24 + $0x10] sm:$0xff] %vm150_vm0, %v144_v2  ;;  %156 = vst.msk [vmem:[%s140_s24 + $0x20] sm:$0xff] %vm150_vm0, %v146_v4 }
  0x37   : > { %155 = vst.msk [vmem:[%s140_s24 + $0x18] sm:$0xf] %vm154_vm1, %v145_v3  ;;  %159 = vst.msk [vmem:[%s140_s24 + $0x38] sm:$0xf] %vm154_vm1, %v149_v7 }
  0x38   : > { %157 = vst.msk [vmem:[%s140_s24 + $0x28] sm:$0xff] %vm150_vm0, %v147_v5  ;;  %158 = vst.msk [vmem:[%s140_s24 + $0x30] sm:$0xff] %vm150_vm0, %v148_v6 }
  0x39 PF: > { %p11_p8 = scmp.ge.s32.totalorder %s385_s11, 6   ;;  %s480_s6 = smov %s342_s7 }
  0x3a   : > { %s481_s7 = smov %s346_s8  ;;  %s482_s8 = smov %s395_s14 }
  0x3b   : > { %s483_s9 = smov %s385_s11  ;;  %13 = sbr.rel (!%p11_p8) target bundleno = 3 (0x3), region = 64 }
  0x40   :  { %184 = vsyncpa [#allocation3], 1 }
  0x41   :  { %186 = vsyncpa [#allocation3 + $0x1], 1 }

</bundles_post_ra>
